<compile_context>
chip_gen: v6e
topology: v6e:2x2x1
jax: 0.10.0
libtpu: 0.0.40
codegen_flags: <defaults>
</compile_context>

<pallas_src>
import functools

import jax
import jax.numpy as jnp
from jax.experimental import pallas as pl
from jax.experimental.pallas import tpu as pltpu


def _round_up(x, m):
    return ((x + m - 1) // m) * m


def _vmem_capacity_bytes():
    """Per-core VMEM capacity; conservative 64 MiB fallback (v7x per-TC)."""
    try:
        info = pltpu.get_tpu_info()
        cap = getattr(info, "vmem_capacity_bytes", None)
        if cap:
            return int(cap)
    except Exception:
        pass
    return 64 * 1024 * 1024


def _default_num_partitions():
    """TensorCore count: 2 on v7x (megacore), 1 on v5e/v6e."""
    try:
        kind = jax.devices()[0].device_kind.lower()
        if "v7" in kind:
            return 2
    except Exception:
        pass
    return 1


def _pick_block_b(B, D, itemsize, num_partitions, vmem_budget, max_block=8192):
    """Largest batch tile whose pipelined footprint fits `vmem_budget`.

    Footprint per row: 2 pipeline buffers x (y1 + y2) at native dtype,
    plus the lane-padded (block_b, 1) t buffers (128 lanes x 4 B each, x2
    buffers) and the (block_b, 1) f32 accumulator scratch (x1).
    """
    per_row = 2 * (2 * D * itemsize) + 2 * 128 * 4 + 128 * 4
    bb = vmem_budget // max(per_row, 1)
    bb = max(8, min(bb, max_block))
    # No point tiling past what one partition actually owns.
    rows_per_part = -(-B // num_partitions)
    bb = min(bb, _round_up(rows_per_part, 8))
    return max(8, (bb // 8) * 8)


def _contrastive_loss_kernel(y1_ref, y2_ref, t_ref, out_ref, acc_ref, *,
                             margin, scale, batch, block_b, tiles_per_part,
                             need_mask):
    p = pl.program_id(0)             # partition ("parallel") axis
    i = pl.program_id(1)             # batch-tile reduction axis

    @pl.when(i == 0)
    def _init():
        acc_ref[...] = jnp.zeros_like(acc_ref)
        out_ref[...] = jnp.zeros_like(out_ref)

    # Load in native dtype, widen to f32 in-vreg (HBM bytes stay at input width).
    y1 = y1_ref[...].astype(jnp.float32)
    y2 = y2_ref[...].astype(jnp.float32)
    diff = y1 - y2                                              # (bb, D)
    dist_sq = jnp.sum(diff * diff, axis=1, keepdims=True)       # (bb, 1)
    dist = jnp.sqrt(dist_sq)                                    # (bb, 1)
    neg = jnp.maximum(margin - dist, 0.0)                       # (bb, 1)
    t = t_ref[...].astype(jnp.float32)                          # (bb, 1)
    per_sample = t * dist_sq + (1.0 - t) * (neg * neg)          # (bb, 1)

    if need_mask:
        # Tail blocks may extend past B (no host-side padding): zero the
        # contribution of any row whose global index is out of range.
        row0 = (p * tiles_per_part + i) * block_b
        rows = row0 + jax.lax.broadcasted_iota(jnp.int32, per_sample.shape, 0)
        per_sample = jnp.where(rows < batch, per_sample, 0.0)

    # Pure VPU elementwise accumulate each step; defer the cross-sublane
    # reduce, scale and scalar store to the final step of this partition.
    acc_ref[...] += per_sample

    @pl.when(i == pl.num_programs(1) - 1)
    def _finalize():
        out_ref[...] += jnp.sum(acc_ref[...]) * scale           # scale = 0.5 / B


def contrastive_loss(y1, y2, t, margin=1.0, num_partitions=None, block_b=None):
    """Pallas TPU implementation of ContrastiveLoss.forward.

    y1, y2: (B, D) float32 or bfloat16
    t:      (B,)   0/1 labels (any real dtype)
    returns scalar float32 loss
    """
    B, D = y1.shape
    assert y2.shape == (B, D)
    assert t.shape == (B,)

    if num_partitions is None:
        num_partitions = _default_num_partitions()
    num_partitions = max(1, min(num_partitions, pl.cdiv(B, 8)))

    total_vmem = _vmem_capacity_bytes()
    vmem_limit = max(32 * 1024 * 1024, min(int(total_vmem * 0.75),
                                           100 * 1024 * 1024))
    itemsize = jnp.dtype(y1.dtype).itemsize
    if block_b is None:
        block_b = _pick_block_b(B, D, itemsize, num_partitions,
                                vmem_budget=int(total_vmem * 0.55))
    block_b = max(8, (block_b // 8) * 8)

    tiles_per_part = pl.cdiv(B, num_partitions * block_b)
    n_valid_blocks = pl.cdiv(B, block_b)
    # Mask only needed if any block is partial / nominally past the end.
    need_mask = (num_partitions * tiles_per_part * block_b) != B

    t_f32 = t.astype(jnp.float32).reshape(B, 1)

    kernel = functools.partial(
        _contrastive_loss_kernel,
        margin=float(margin),
        scale=0.5 / float(B),
        batch=B,
        block_b=block_b,
        tiles_per_part=tiles_per_part,
        need_mask=need_mask,
    )

    def row_map(p, i):
        # Clamp so fully-out-of-range nominal blocks re-read a valid block
        # (their contribution is zeroed in-kernel via the row mask).
        return (jnp.minimum(p * tiles_per_part + i, n_valid_blocks - 1), 0)

    # TODO(synk): for extremely wide D (block_b*D no longer fits VMEM even at
    # block_b=8) add an inner "arbitrary" D-tile axis with a (block_b,1)
    # scratch accumulator; not needed for typical embedding widths.
    out = pl.pallas_call(
        kernel,
        out_shape=jax.ShapeDtypeStruct((num_partitions, 1, 1), jnp.float32),
        grid_spec=pltpu.PrefetchScalarGridSpec(
            num_scalar_prefetch=0,
            grid=(num_partitions, tiles_per_part),
            in_specs=[
                pl.BlockSpec((block_b, D), row_map),
                pl.BlockSpec((block_b, D), row_map),
                pl.BlockSpec((block_b, 1), row_map),
            ],
            out_specs=pl.BlockSpec((1, 1, 1), lambda p, i: (p, 0, 0)),
            scratch_shapes=[pltpu.VMEM((block_b, 1), jnp.float32)],
        ),
        compiler_params=pltpu.CompilerParams(
            # Partition axis uses both TCs on v7x (harmless size-1 loop on
            # v5e/v6e where num_partitions defaults to 1); batch-tile axis is
            # a reduction.
            dimension_semantics=("parallel", "arbitrary"),
            vmem_limit_bytes=vmem_limit,
        ),
    )(y1, y2, t_f32)

    # Each partition's partial is already scaled by 0.5/B; sum the partials.
    return jnp.sum(out)


def contrastive_loss_ref(y1, y2, t, margin=1.0):
    """Pure-JAX reference matching the PyTorch forward exactly."""
    diff = y1 - y2
    dist_sq = jnp.sum(diff**2, axis=1)
    dist = jnp.sqrt(dist_sq)
    neg = jnp.maximum(margin - dist, 0.0)
    loss = (t * dist_sq + (1.0 - t) * neg**2) / 2.0
    return jnp.sum(loss) / y1.shape[0]


if __name__ == "__main__":
    key = jax.random.PRNGKey(0)
    k1, k2, k3 = jax.random.split(key, 3)

    # Case 1: small tile-friendly f32 input.
    B, D = 16, 128
    y1 = jax.random.normal(k1, (B, D), dtype=jnp.float32)
    y2 = jax.random.normal(k2, (B, D), dtype=jnp.float32)
    t = jax.random.bernoulli(k3, 0.5, (B,)).astype(jnp.float32)

    loss = jax.block_until_ready(contrastive_loss(y1, y2, t, margin=1.0))
    ref = contrastive_loss_ref(y1, y2, t, margin=1.0)
    assert jnp.allclose(loss, ref, rtol=1e-5, atol=1e-5), (loss, ref)

    # Case 2: ragged batch (exercises the in-kernel tail-masking path,
    # no host-side padding of the inputs).
    Br = 13
    loss_r = jax.block_until_ready(
        contrastive_loss(y1[:Br], y2[:Br], t[:Br], margin=1.0))
    ref_r = contrastive_loss_ref(y1[:Br], y2[:Br], t[:Br], margin=1.0)
    assert jnp.allclose(loss_r, ref_r, rtol=1e-5, atol=1e-5), (loss_r, ref_r)

    # Case 3: bf16 inputs stay bf16 on the wire (halves HBM bytes read).
    y1b = y1.astype(jnp.bfloat16)
    y2b = y2.astype(jnp.bfloat16)
    loss_b = jax.block_until_ready(contrastive_loss(y1b, y2b, t, margin=1.0))
    ref_b = contrastive_loss_ref(
        y1b.astype(jnp.float32), y2b.astype(jnp.float32), t, margin=1.0)
    assert jnp.allclose(loss_b, ref_b, rtol=1e-4, atol=1e-4), (loss_b, ref_b)

    # Case 4: ragged batch forced onto 2 partitions (exercises the clamped
    # index_map + fully-masked nominal tail block path used on v7x).
    loss_p = jax.block_until_ready(
        contrastive_loss(y1[:Br], y2[:Br], t[:Br], margin=1.0,
                         num_partitions=2, block_b=8))
    assert jnp.allclose(loss_p, ref_r, rtol=1e-5, atol=1e-5), (loss_p, ref_r)

    print("KERNEL_OK")
</pallas_src>

<mosaic_0001>
module attributes {stable_mosaic.version = 11 : i64} {
  func.func @_contrastive_loss_kernel(%arg0: i32, %arg1: i32, %arg2: memref<16x128xf32, #tpu.memory_space<vmem>>, %arg3: memref<16x128xf32, #tpu.memory_space<vmem>>, %arg4: memref<16x1xf32, #tpu.memory_space<vmem>>, %arg5: memref<1x1x1xf32, #tpu.memory_space<vmem>>, %arg6: memref<16x1xf32, #tpu.memory_space<vmem>>) attributes {dimension_semantics = [#tpu.dimension_semantics<parallel>, #tpu.dimension_semantics<arbitrary>], iteration_bounds = array<i64: 1, 1>, scalar_prefetch = 0 : i64, scratch_operands = 1 : i64, tpu.core_type = #tpu.core_type<tc>, window_params = [{transform_indices = @transform_0, window_bounds = array<i64: 16, 128>}, {transform_indices = @transform_1, window_bounds = array<i64: 16, 128>}, {transform_indices = @transform_2, window_bounds = array<i64: 16, 1>}, {transform_indices = @transform_3, window_bounds = array<i64: 1, 1, 1>}]} {
    %c0_i32 = arith.constant 0 : i32
    %0 = arith.cmpi eq, %arg1, %c0_i32 : i32
    %1 = arith.extui %0 : i1 to i32
    %c0_i32_0 = arith.constant 0 : i32
    %2 = arith.cmpi ne, %1, %c0_i32_0 : i32
    scf.if %2 {
      %cst_15 = arith.constant 0.000000e+00 : f32
      %27 = vector.broadcast %cst_15 : f32 to vector<16x1xf32>
      %c0_16 = arith.constant 0 : index
      %c0_17 = arith.constant 0 : index
      %28 = vector.load %arg6[%c0_16, %c0_17] : memref<16x1xf32, #tpu.memory_space<vmem>>, vector<16x1xf32>
      tpu.vector_store %arg6[%c0_16, %c0_17], %27 {strides = array<i32>} : memref<16x1xf32, #tpu.memory_space<vmem>>, vector<16x1xf32>,
      %cst_18 = arith.constant 0.000000e+00 : f32
      %29 = vector.broadcast %cst_18 : f32 to vector<1x1x1xf32>
      %c0_19 = arith.constant 0 : index
      %c0_20 = arith.constant 0 : index
      %c0_21 = arith.constant 0 : index
      %30 = vector.load %arg5[%c0_19, %c0_20, %c0_21] : memref<1x1x1xf32, #tpu.memory_space<vmem>>, vector<1x1x1xf32>
      tpu.vector_store %arg5[%c0_19, %c0_20, %c0_21], %29 {strides = array<i32>} : memref<1x1x1xf32, #tpu.memory_space<vmem>>, vector<1x1x1xf32>,
    } else {
    }
    %c0 = arith.constant 0 : index
    %c0_1 = arith.constant 0 : index
    %3 = vector.load %arg2[%c0, %c0_1] : memref<16x128xf32, #tpu.memory_space<vmem>>, vector<16x128xf32>
    %c0_2 = arith.constant 0 : index
    %c0_3 = arith.constant 0 : index
    %4 = vector.load %arg3[%c0_2, %c0_3] : memref<16x128xf32, #tpu.memory_space<vmem>>, vector<16x128xf32>
    %5 = arith.subf %3, %4 : vector<16x128xf32>
    %6 = arith.mulf %5, %5 : vector<16x128xf32>
    %cst = arith.constant dense<0.000000e+00> : vector<16xf32>
    %7 = vector.multi_reduction <add>, %6, %cst [1] : vector<16x128xf32> to vector<16xf32>
    %8 = vector.shape_cast %7 : vector<16xf32> to vector<16x1xf32>
    %9 = math.sqrt %8 : vector<16x1xf32>
    %cst_4 = arith.constant 1.000000e+00 : f32
    %10 = vector.broadcast %cst_4 : f32 to vector<16x1xf32>
    %11 = arith.subf %10, %9 : vector<16x1xf32>
    %cst_5 = arith.constant 0.000000e+00 : f32
    %12 = vector.broadcast %cst_5 : f32 to vector<16x1xf32>
    %13 = arith.maximumf %11, %12 : vector<16x1xf32>
    %c0_6 = arith.constant 0 : index
    %c0_7 = arith.constant 0 : index
    %14 = vector.load %arg4[%c0_6, %c0_7] : memref<16x1xf32, #tpu.memory_space<vmem>>, vector<16x1xf32>
    %15 = arith.mulf %14, %8 : vector<16x1xf32>
    %cst_8 = arith.constant 1.000000e+00 : f32
    %16 = vector.broadcast %cst_8 : f32 to vector<16x1xf32>
    %17 = arith.subf %16, %14 : vector<16x1xf32>
    %18 = arith.mulf %13, %13 : vector<16x1xf32>
    %19 = arith.mulf %17, %18 : vector<16x1xf32>
    %20 = arith.addf %15, %19 : vector<16x1xf32>
    %c0_9 = arith.constant 0 : index
    %c0_10 = arith.constant 0 : index
    %21 = vector.load %arg6[%c0_9, %c0_10] : memref<16x1xf32, #tpu.memory_space<vmem>>, vector<16x1xf32>
    %22 = arith.addf %21, %20 : vector<16x1xf32>
    %c0_11 = arith.constant 0 : index
    %c0_12 = arith.constant 0 : index
    %23 = vector.load %arg6[%c0_11, %c0_12] : memref<16x1xf32, #tpu.memory_space<vmem>>, vector<16x1xf32>
    tpu.vector_store %arg6[%c0_11, %c0_12], %22 {strides = array<i32>} : memref<16x1xf32, #tpu.memory_space<vmem>>, vector<16x1xf32>,
    %c0_i32_13 = arith.constant 0 : i32
    %24 = arith.cmpi eq, %arg1, %c0_i32_13 : i32
    %25 = arith.extui %24 : i1 to i32
    %c0_i32_14 = arith.constant 0 : i32
    %26 = arith.cmpi ne, %25, %c0_i32_14 : i32
    scf.if %26 {
      %c0_15 = arith.constant 0 : index
      %c0_16 = arith.constant 0 : index
      %c0_17 = arith.constant 0 : index
      %27 = vector.load %arg5[%c0_15, %c0_16, %c0_17] : memref<1x1x1xf32, #tpu.memory_space<vmem>>, vector<1x1x1xf32>
      %c0_18 = arith.constant 0 : index
      %c0_19 = arith.constant 0 : index
      %28 = vector.load %arg6[%c0_18, %c0_19] : memref<16x1xf32, #tpu.memory_space<vmem>>, vector<16x1xf32>
      %29 = vector.shape_cast %28 : vector<16x1xf32> to vector<1x16x1xf32>
      %cst_20 = arith.constant dense<0.000000e+00> : vector<1xf32>
      %30 = vector.multi_reduction <add>, %29, %cst_20 [1, 2] : vector<1x16x1xf32> to vector<1xf32>
      %31 = vector.shape_cast %30 : vector<1xf32> to vector<1x1x1xf32>
      %32 = vector.extract %31[0, 0, 0] : f32 from vector<1x1x1xf32>
      %cst_21 = arith.constant 3.125000e-02 : f32
      %33 = arith.mulf %32, %cst_21 : f32
      %34 = vector.broadcast %33 : f32 to vector<1x1x1xf32>
      %35 = arith.addf %27, %34 : vector<1x1x1xf32>
      %c0_22 = arith.constant 0 : index
      %c0_23 = arith.constant 0 : index
      %c0_24 = arith.constant 0 : index
      %36 = vector.load %arg5[%c0_22, %c0_23, %c0_24] : memref<1x1x1xf32, #tpu.memory_space<vmem>>, vector<1x1x1xf32>
      tpu.vector_store %arg5[%c0_22, %c0_23, %c0_24], %35 {strides = array<i32>} : memref<1x1x1xf32, #tpu.memory_space<vmem>>, vector<1x1x1xf32>,
    } else {
    }
    return
  }
  func.func @transform_0(%arg0: i32, %arg1: i32) -> (i32, i32) {
    %c1_i32 = arith.constant 1 : i32
    %0 = arith.muli %arg0, %c1_i32 : i32
    %1 = arith.addi %0, %arg1 : i32
    %c0_i32 = arith.constant 0 : i32
    %2 = arith.minsi %1, %c0_i32 : i32
    %c0_i32_0 = arith.constant 0 : i32
    %c0_i32_1 = arith.constant 0 : i32
    return %2, %c0_i32_0 : i32, i32
  }
  func.func @transform_1(%arg0: i32, %arg1: i32) -> (i32, i32) {
    %c1_i32 = arith.constant 1 : i32
    %0 = arith.muli %arg0, %c1_i32 : i32
    %1 = arith.addi %0, %arg1 : i32
    %c0_i32 = arith.constant 0 : i32
    %2 = arith.minsi %1, %c0_i32 : i32
    %c0_i32_0 = arith.constant 0 : i32
    %c0_i32_1 = arith.constant 0 : i32
    return %2, %c0_i32_0 : i32, i32
  }
  func.func @transform_2(%arg0: i32, %arg1: i32) -> (i32, i32) {
    %c1_i32 = arith.constant 1 : i32
    %0 = arith.muli %arg0, %c1_i32 : i32
    %1 = arith.addi %0, %arg1 : i32
    %c0_i32 = arith.constant 0 : i32
    %2 = arith.minsi %1, %c0_i32 : i32
    %c0_i32_0 = arith.constant 0 : i32
    %c0_i32_1 = arith.constant 0 : i32
    return %2, %c0_i32_0 : i32, i32
  }
  func.func @transform_3(%arg0: i32, %arg1: i32) -> (i32, i32, i32) {
    %c0_i32 = arith.constant 0 : i32
    %c0_i32_0 = arith.constant 0 : i32
    %c0_i32_1 = arith.constant 0 : i32
    return %arg0, %c0_i32, %c0_i32_0 : i32, i32, i32
  }
}

</mosaic_0001>

<bundles_post_ra>
// kernel: tpu_custom_call.1
= control target key start
LH: loop header
LB: loop body
LE: loop exit
PB: predicated region body
PF: predicated region fallthrough
CT: control target
= control target key end

     0   :  { %8 = vsyncpa [#allocation4], 0  ;;  %s319_s0 = inlined_call_operand.vmem [shape: f32[16,128], index: 0, kind: input, shape index: {}]   ;;  %s320_s1 = inlined_call_operand.hbm [shape: f32[16,128], index: 1, kind: input, shape index: {}]   ;;  %s321_s2 = inlined_call_operand.vmem [shape: f32[16,1], index: 2, kind: input, shape index: {}]   ;;  %s322_s3 = inlined_call_operand.hbm [shape: f32[1,1,1], index: 3, kind: output, shape index: {}]  }
   0x1   :  { %9 = vsyncpa [#allocation5], 0  ;;  %s268_s12 = smov [#allocation3]  }
   0x2   :  { %s35_s13 = sshll.u32 %s268_s12, 4  ;;  %s36_s13 = int_to_ptr.vmem [resolvable:$true] %s35_s13 }
   0x3   :  { %s232_s14 = scalar_lea.vmem %s36_s13, 256  ;;  %p237_p1 = scmp.lt.s32.totalorder %s36_s13, %s36_s13 }
   0x4   :  { %p233_p0 = scmp.ne.s32.totalorder %s36_s13, %s232_s14  ;;  %p238_p2 = scmp.lt.s32.totalorder %s232_s14, %s232_s14 }
   0x6   :  { %p239_p3 = por %p238_p2, %p237_p1 }
   0x8   :  { %p240_p4 = pnand %p239_p3, %p233_p0 }
   0xa   :  { %243 = shalt.err (!%p240_p4)
}
   0xb   :  { %s269_s15 = smov 128   ;;  %s270_s16 = smov 8  }
   0xc   :  { %41 = dma.hbm_to_vmem [thread:$0]  %s320_s1, 256, %s36_s13, [#allocation4], %s269_s15, %s269_s15, %s270_s16  }
   0xd   :  { %264 = dma.done.wait [#allocation4], 256  }
   0xe   :  { %265 = vsyncadd [#allocation4], 4294967040  ;;  %v112_v0 = vld [vmem:[%s319_s0] sm:$0xff]  ;;  %v114_v1 = vld [vmem:[#allocation3] sm:$0xff]  ;;  %vm107_vm0 = vcmask 7168   ;;  %v271_v8 = vmov 0.0  }
   0xf   :  { %v113_v2 = vld [vmem:[%s319_s0 + $0x8] sm:$0xff]  ;;  %v116_v3 = vsub.f32 %v112_v0, %v114_v1  ;;  %v115_v4 = vld [vmem:[#allocation3 + $0x8] sm:$0xff]  ;;  %108 = vst.msk [vmem:[#allocation2] sm:$0xff] %vm107_vm0, %v271_v8  ;;  %109 = vst.msk [vmem:[#allocation2 + $0x8] sm:$0xff] %vm107_vm0, %v271_v8  ;;  %vm110_vm5 = vcmask 0   ;;  %s272_s26 = smov [#allocation6]  }
  0x10   :  { %v117_v5 = vsub.f32 %v113_v2, %v115_v4  ;;  %v142_v19 = vld [vmem:[%s321_s2] sm:$0xff]  ;;  %v143_v27 = vld [vmem:[%s321_s2 + $0x8] sm:$0xff]  ;;  %111 = vst.msk [vmem:[#allocation6] sm:$0x1] %vm110_vm5, %v271_v8  ;;  %s190_s27 = sshll.u32 %s272_s26, 4  ;;  %s191_s27 = int_to_ptr.vmem [resolvable:$true] %s190_s27 }
  0x11   :  { %v118_v6 = vmul.f32 %v116_v3, %v116_v3  ;;  %v146_v21 = vsub.f32 1.0, %v142_v19  ;;  %v147_v30 = vsub.f32 1.0, %v143_v27  ;;  %s244_s28 = scalar_lea.vmem %s191_s27, 16  ;;  %s248_s29 = scalar_lea.vmem %s191_s27, 32 }
  0x12   :  { %v119_v7 = vmul.f32 %v117_v5, %v117_v5  ;;  %p245_p5 = scmp.ne.s32.totalorder %s191_s27, %s244_s28  ;;  %p249_p6 = scmp.lt.s32.totalorder %s191_s27, %s191_s27 }
  0x13   :  { %120 = vadd.xlane.f32.xlu0 %v118_v6  ;;  %p250_p7 = scmp.lt.s32.totalorder %s248_s29, %s244_s28 }
  0x15   :  { %p251_p8 = por %p250_p7, %p249_p6 }
  0x16   :  { %v154_v32 = vld [vmem:[#allocation2] sm:$0xff]  ;;  %v155_v38 = vld [vmem:[#allocation2 + $0x8] sm:$0xff] }
  0x17   :  { %122 = vadd.xlane.f32.xlu0 %v119_v7  ;;  %v164_v53 = vld [vmem:[#allocation6] sm:$0x1]  ;;  %p252_p9 = pnand %p251_p8, %p245_p5 }
  0x9c   :  { %v121_v9 = vpop.xlane.xlu0 %120 }
  0x9d   :  { %220 = vrsqrt.f32 %v121_v9  ;;  %vm126_vm1 = vcmp.eq.f32.partialorder %v121_v9, inf  ;;  %v129_v13 = vand.u32 2147483648, %v121_v9  ;;  %vm128_vm2 = vcmp.eq.f32.partialorder %v121_v9, 0.0 }
  0x9e   :  { %v144_v28 = vmul.f32 %v142_v19, %v121_v9 }
  0xa0   :  { %v123_v10 = vpop.xlane.xlu0 %122 }
  0xa1   :  { %222 = vrsqrt.f32 %v123_v10  ;;  %vm133_vm3 = vcmp.eq.f32.partialorder %v123_v10, inf  ;;  %v136_v20 = vand.u32 2147483648, %v123_v10  ;;  %vm135_vm4 = vcmp.eq.f32.partialorder %v123_v10, 0.0 }
  0xa2   :  { %v145_v35 = vmul.f32 %v143_v27, %v123_v10 }
  0xaa   :  { %v221_v11 = vpop.eup %220 }
  0xab   :  { %v125_v12 = vmul.f32 %v221_v11, %v121_v9 }
  0xad   :  { %v127_v14 = vsel %vm126_vm1, %v121_v9, %v125_v12 }
  0xae   :  { %v223_v15 = vpop.eup %222  ;;  %v130_v16 = vsel %vm128_vm2, %v129_v13, %v127_v14 }
  0xaf   :  { %v138_v17 = vsub.f32 1.0, %v130_v16  ;;  %v132_v18 = vmul.f32 %v223_v15, %v123_v10 }
  0xb1   :  { %v140_v22 = vmax.f32 %v138_v17, 0.0  ;;  %v134_v23 = vsel %vm133_vm3, %v123_v10, %v132_v18 }
  0xb2   :  { %v137_v24 = vsel %vm135_vm4, %v136_v20, %v134_v23 }
  0xb3   :  { %v148_v25 = vmul.f32 %v140_v22, %v140_v22  ;;  %v139_v26 = vsub.f32 1.0, %v137_v24 }
  0xb5   :  { %v150_v29 = vmul.f32 %v148_v25, %v146_v21  ;;  %v141_v31 = vmax.f32 %v139_v26, 0.0 }
  0xb7   :  { %v152_v33 = vadd.f32 %v150_v29, %v144_v28  ;;  %v149_v34 = vmul.f32 %v141_v31, %v141_v31 }
  0xb9   :  { %v151_v36 = vmul.f32 %v149_v34, %v147_v30  ;;  %v156_v37 = vadd.f32 %v154_v32, %v152_v33 }
  0xbb   :  { %v153_v39 = vadd.f32 %v151_v36, %v145_v35  ;;  %159 = vst.msk [vmem:[#allocation2] sm:$0xff] %vm107_vm0, %v156_v37 }
  0xbd   :  { %v157_v40 = vadd.f32 %v155_v38, %v153_v39 }
  0xbf   :  { %160 = vst.msk [vmem:[#allocation2 + $0x8] sm:$0xff] %vm107_vm0, %v157_v40 }
  0xc2   :  { %v165_v41 = vld [vmem:[#allocation2] sm:$0xff] }
  0xc3   :  { %v167_v43 = vsel %vm107_vm0, %v165_v41, 0.0 }
  0xc6   :  { %v166_v42 = vld [vmem:[#allocation2 + $0x8] sm:$0xff] }
  0xc7   :  { %v168_v44 = vsel %vm107_vm0, %v166_v42, 0.0 }
  0xc8   :  { %v169_v45 = vadd.f32 %v168_v44, %v167_v43 }
  0xca   :  { %170 = vadd.xlane.f32.xlu1 %v169_v45 }
 0x153   :  { %v171_v46 = vpop.xlane.xlu1 %170 }
 0x154   :  { %v172_v47 = vrot.slane %v171_v46, 4 }
 0x156   :  { %v173_v48 = vadd.f32 %v172_v47, %v171_v46 }
 0x158   :  { %v174_v49 = vrot.slane %v173_v48, 2 }
 0x15a   :  { %v175_v50 = vadd.f32 %v174_v49, %v173_v48 }
 0x15c   :  { %v176_v51 = vrot.slane %v175_v50, 1 }
 0x15e   :  { %v177_v52 = vadd.f32 %v176_v51, %v175_v50 }
 0x160   :  { %213 = vpush %v177_v52 }
 0x191   :  { %s214_s2 = spop %213 }
 0x192   :  { %s179_s25 = smul.f32 0.03125, %s214_s2 }
 0x194   :  { %v180_v54 = vstv %s179_s25 }
 0x195   :  { %v181_v55 = vadd.f32 %v180_v54, %v164_v53 }
 0x197   :  { %183 = vst.msk [vmem:[#allocation6] sm:$0x1] %vm110_vm5, %v181_v55 }
 0x198   :  { %255 = shalt.err (!%p252_p9)
}
 0x199   :  { %193 = dma.vmem_to_hbm [thread:$0]  %s191_s27, 16, %s322_s3, [#allocation5]  }
 0x19a   :  { %266 = dma.done.wait [#allocation5], 16  }
 0x19b   :  { %267 = vsyncadd [#allocation5], 4294967280 }
 0x19c   :  { %197 = vsyncpa [#allocation4], 1 }
 0x19d   :  { %198 = vsyncpa [#allocation5], 1 }

</bundles_post_ra>
